<compile_context>
chip_gen: v6e
topology: v6e:2x2x1
jax: 0.10.0
libtpu: 0.0.40
codegen_flags: <defaults>
</compile_context>

<pallas_src>
import jax
import jax.numpy as jnp
from jax.experimental import pallas as pl
from jax.experimental.pallas import tpu as pltpu


def _softshrink_kernel(t_ref, x_ref, o_ref):
    # t_ref: (TILE_ROWS, 1) f32 VMEM; x_ref / o_ref: (TILE_ROWS, H*W) VMEM.
    x = x_ref[...]
    xf = x.astype(jnp.float32)                 # keep VPU math in f32 (v5e-safe)
    t = t_ref[...]                             # (TILE_ROWS, 1), broadcasts over lanes
    r = jnp.abs(xf)
    denom = r + (r < t).astype(jnp.float32)    # +1 where r < t (output is 0 there)
    gain = jnp.maximum(r - t, 0.0) * pl.reciprocal(denom, approx=False)
    o_ref[...] = (xf * gain).astype(o_ref.dtype)


def _choose_tile_rows(num_rows, row_bytes, target_bytes):
    """Pick rows-per-block: ~target_bytes per block, multiple of 8 (or = num_rows)."""
    tr = max(1, target_bytes // max(row_bytes, 1))
    if tr >= num_rows:
        return num_rows
    tr = max(8, (tr // 8) * 8)
    return min(tr, num_rows)


def soft_shrink(x, thresh, *, target_block_bytes=2 << 20):
    """Applies per-channel soft shrinkage. x: (N, C, H, W), thresh: (C,)."""
    if x.size == 0:
        return x
    N, C, H, W = x.shape
    assert thresh.shape == (C,)

    R, L = N * C, H * W
    x2 = x.reshape(R, L)                                   # lane-dense rows
    t = jnp.abs(thresh).astype(jnp.float32)                # module uses |thresh|
    t_rows = jnp.broadcast_to(t[None, :], (N, C)).reshape(R, 1)

    row_bytes = L * x.dtype.itemsize
    tile_rows = _choose_tile_rows(R, row_bytes, target_block_bytes)
    grid = (pl.cdiv(R, tile_rows),)

    y2 = pl.pallas_call(
        _softshrink_kernel,
        out_shape=jax.ShapeDtypeStruct((R, L), x.dtype),
        grid=grid,
        in_specs=[
            pl.BlockSpec((tile_rows, 1), lambda i: (i, 0)),   # per-row threshold
            pl.BlockSpec((tile_rows, L), lambda i: (i, 0)),   # x rows
        ],
        out_specs=pl.BlockSpec((tile_rows, L), lambda i: (i, 0)),
        compiler_params=pltpu.CompilerParams(
            dimension_semantics=("parallel",)),               # shard rows over TCs
    )(t_rows, x2)

    return y2.reshape(N, C, H, W)


def soft_shrink_ref(x, thresh):
    """Pure-JAX reference matching the PyTorch forward exactly."""
    t = jnp.abs(thresh).astype(jnp.float32)
    t2 = t.reshape(-1, 1, 1)                  # (C, 1, 1) broadcasts over N, H, W
    xf = x.astype(jnp.float32)
    r = jnp.abs(xf)
    denom = r + (r < t2).astype(jnp.float32)
    gain = jnp.maximum(r - t2, 0.0) / denom
    return (xf * gain).astype(x.dtype)


if __name__ == "__main__":
    key = jax.random.PRNGKey(0)
    k_x, k_t = jax.random.split(key)

    N, C, H, W = 2, 4, 16, 16
    x = jax.random.normal(k_x, (N, C, H, W), dtype=jnp.float32)
    # Deterministic parameter init matching nn.Parameter(0.1 * torch.rand(C)).
    thresh = 0.1 * jax.random.uniform(k_t, (C,), dtype=jnp.float32)

    y = soft_shrink(x, thresh)
    jax.block_until_ready(y)

    y_ref = soft_shrink_ref(x, thresh)
    assert y.shape == x.shape and y.dtype == x.dtype
    assert jnp.allclose(y, y_ref, atol=1e-6, rtol=1e-6), "mismatch vs reference"

    # Extra check: rows-per-block not dividing N*C (channel/threshold alignment).
    N2, C2, H2, W2 = 3, 5, 8, 32
    x2 = jax.random.normal(k_x, (N2, C2, H2, W2), dtype=jnp.float32)
    t2 = 0.1 * jax.random.uniform(k_t, (C2,), dtype=jnp.float32)
    y2 = soft_shrink(x2, t2, target_block_bytes=8 * W2 * H2 * 4)  # forces tiling
    jax.block_until_ready(y2)
    assert jnp.allclose(y2, soft_shrink_ref(x2, t2), atol=1e-6, rtol=1e-6), \
        "mismatch vs reference (tiled rows)"

    print("KERNEL_OK")
</pallas_src>

<mosaic_0001>
module attributes {stable_mosaic.version = 11 : i64} {
  func.func @_softshrink_kernel(%arg0: i32, %arg1: memref<8x1xf32, #tpu.memory_space<vmem>>, %arg2: memref<8x256xf32, #tpu.memory_space<vmem>>, %arg3: memref<8x256xf32, #tpu.memory_space<vmem>>) attributes {dimension_semantics = [#tpu.dimension_semantics<parallel>], iteration_bounds = array<i64: 1>, scalar_prefetch = 0 : i64, scratch_operands = 0 : i64, tpu.core_type = #tpu.core_type<tc>, window_params = [{transform_indices = @transform_0, window_bounds = array<i64: 8, 1>}, {transform_indices = @transform_1, window_bounds = array<i64: 8, 256>}, {transform_indices = @transform_2, window_bounds = array<i64: 8, 256>}]} {
    %c0 = arith.constant 0 : index
    %c0_0 = arith.constant 0 : index
    %0 = vector.load %arg2[%c0, %c0_0] : memref<8x256xf32, #tpu.memory_space<vmem>>, vector<8x256xf32>
    %c0_1 = arith.constant 0 : index
    %c0_2 = arith.constant 0 : index
    %1 = vector.load %arg1[%c0_1, %c0_2] : memref<8x1xf32, #tpu.memory_space<vmem>>, vector<8x1xf32>
    %2 = math.absf %0 : vector<8x256xf32>
    %3 = vector.broadcast %1 : vector<8x1xf32> to vector<8x256xf32>
    %4 = arith.cmpf olt, %2, %3 : vector<8x256xf32>
    %5 = arith.extui %4 : vector<8x256xi1> to vector<8x256xi32>
    %6 = arith.sitofp %5 : vector<8x256xi32> to vector<8x256xf32>
    %7 = arith.addf %2, %6 : vector<8x256xf32>
    %8 = vector.broadcast %1 : vector<8x1xf32> to vector<8x256xf32>
    %9 = arith.subf %2, %8 : vector<8x256xf32>
    %cst = arith.constant 0.000000e+00 : f32
    %10 = vector.broadcast %cst : f32 to vector<8x256xf32>
    %11 = arith.maximumf %9, %10 : vector<8x256xf32>
    %12 = tpu.reciprocal %7 : vector<8x256xf32> -> vector<8x256xf32>
    %13 = arith.mulf %11, %12 : vector<8x256xf32>
    %14 = arith.mulf %0, %13 : vector<8x256xf32>
    %c0_3 = arith.constant 0 : index
    %c0_4 = arith.constant 0 : index
    %15 = vector.load %arg3[%c0_3, %c0_4] : memref<8x256xf32, #tpu.memory_space<vmem>>, vector<8x256xf32>
    tpu.vector_store %arg3[%c0_3, %c0_4], %14 {strides = array<i32>} : memref<8x256xf32, #tpu.memory_space<vmem>>, vector<8x256xf32>,
    return
  }
  func.func @transform_0(%arg0: i32) -> (i32, i32) {
    %c0_i32 = arith.constant 0 : i32
    %c0_i32_0 = arith.constant 0 : i32
    return %arg0, %c0_i32 : i32, i32
  }
  func.func @transform_1(%arg0: i32) -> (i32, i32) {
    %c0_i32 = arith.constant 0 : i32
    %c0_i32_0 = arith.constant 0 : i32
    return %arg0, %c0_i32 : i32, i32
  }
  func.func @transform_2(%arg0: i32) -> (i32, i32) {
    %c0_i32 = arith.constant 0 : i32
    %c0_i32_0 = arith.constant 0 : i32
    return %arg0, %c0_i32 : i32, i32
  }
}

</mosaic_0001>

<bundles_post_ra>
// kernel: tpu_custom_call.1
= control target key start
LH: loop header
LB: loop body
LE: loop exit
PB: predicated region body
PF: predicated region fallthrough
CT: control target
= control target key end

     0   :  { %7 = vsyncpa [#allocation3], 0  ;;  %s152_s0 = inlined_call_operand.vmem [shape: f32[8,1], index: 0, kind: input, shape index: {}]   ;;  %s153_s1 = inlined_call_operand.hbm [shape: f32[8,256], index: 1, kind: input, shape index: {}]   ;;  %s154_s2 = inlined_call_operand.hbm [shape: f32[8,256], index: 2, kind: output, shape index: {}]  }
   0x1   :  { %8 = vsyncpa [#allocation4], 0  ;;  %s124_s9 = smov [#allocation2]  }
   0x2   :  { %s17_s10 = sshll.u32 %s124_s9, 4  ;;  %s18_s10 = int_to_ptr.vmem [resolvable:$true] %s17_s10 }
   0x3   :  { %s88_s11 = scalar_lea.vmem %s18_s10, 256  ;;  %p93_p1 = scmp.lt.s32.totalorder %s18_s10, %s18_s10 }
   0x4   :  { %p89_p0 = scmp.ne.s32.totalorder %s18_s10, %s88_s11  ;;  %p94_p2 = scmp.lt.s32.totalorder %s88_s11, %s88_s11 }
   0x6   :  { %p95_p3 = por %p94_p2, %p93_p1 }
   0x8   :  { %p96_p4 = pnand %p95_p3, %p89_p0 }
   0xa   :  { %99 = shalt.err (!%p96_p4)
}
   0xb   :  { %20 = dma.hbm_to_vmem [thread:$0]  %s153_s1, 256, %s18_s10, [#allocation3]  }
   0xc   :  { %120 = dma.done.wait [#allocation3], 256  }
   0xd   :  { %121 = vsyncadd [#allocation3], 4294967040  ;;  %v125_v0 = vmov 0   ;;  %v26_v1 = vld [vmem:[%s152_s0] sm:$0xff]  ;;  %v25_v3 = vld [vmem:[#allocation2 + $0x8] sm:$0xff]  ;;  %v126_v7 = vmov 0.0  }
   0xe   :  { %75 = vset.pattern.permute.xlu0 %v125_v0  ;;  %v24_v2 = vld [vmem:[#allocation2] sm:$0xff]  ;;  %v28_v5 = vand.u32 2147483647, %v25_v3  ;;  %s127_s0 = smov [#allocation5]  }
   0xf   :  { %31 = vperm.xlu0 %75, %v26_v1   ;;  %v27_v4 = vand.u32 2147483647, %v24_v2  ;;  %s60_s1 = sshll.u32 %s127_s0, 4  ;;  %s61_s1 = int_to_ptr.vmem [resolvable:$true] %s60_s1 }
  0x10   :  { %s100_s16 = scalar_lea.vmem %s61_s1, 256  ;;  %p105_p6 = scmp.lt.s32.totalorder %s61_s1, %s61_s1 }
  0x11   :  { %p101_p5 = scmp.ne.s32.totalorder %s61_s1, %s100_s16  ;;  %p106_p7 = scmp.lt.s32.totalorder %s100_s16, %s100_s16 }
  0x13   :  { %p107_p8 = por %p106_p7, %p105_p6 }
  0x15   :  { %p108_p9 = pnand %p107_p8, %p101_p5 }
  0x8a   :  { %v32_v6 = vpop.permute.xlu0 %31 }
  0x8b   :  { %vm34_vm0 = vcmp.lt.f32.partialorder %v27_v4, %v32_v6  ;;  %vm35_vm1 = vcmp.lt.f32.partialorder %v28_v5, %v32_v6  ;;  %v42_v12 = vsub.f32 %v27_v4, %v32_v6  ;;  %v43_v13 = vsub.f32 %v28_v5, %v32_v6 }
  0x8c   :  { %v69_v8 = vsel %vm34_vm0, 1.0, %v126_v7  ;;  %v70_v9 = vsel %vm35_vm1, 1.0, %v126_v7 }
  0x8d   :  { %v40_v10 = vadd.f32 %v69_v8, %v27_v4  ;;  %v41_v11 = vadd.f32 %v70_v9, %v28_v5  ;;  %v44_v14 = vmax.f32 %v42_v12, 0.0  ;;  %v45_v16 = vmax.f32 %v43_v13, 0.0 }
  0x8f   :  { %76 = vrcp.f32 %v40_v10 }
  0x90   :  { %78 = vrcp.f32 %v41_v11 }
  0x9c   :  { %v77_v15 = vpop.eup %76 }
  0x9d   :  { %v79_v17 = vpop.eup %78  ;;  %v48_v18 = vmul.f32 %v77_v15, %v44_v14 }
  0x9e   :  { %v49_v19 = vmul.f32 %v79_v17, %v45_v16 }
  0x9f   :  { %v50_v20 = vmul.f32 %v48_v18, %v24_v2 }
  0xa0   :  { %v51_v21 = vmul.f32 %v49_v19, %v25_v3 }
  0xa1   :  { %52 = vst [vmem:[#allocation5] sm:$0xff] %v50_v20 }
  0xa2   :  { %53 = vst [vmem:[#allocation5 + $0x8] sm:$0xff] %v51_v21 }
  0xa3   :  { %111 = shalt.err (!%p108_p9)
}
  0xa4   :  { %63 = dma.vmem_to_hbm [thread:$0]  %s61_s1, 256, %s154_s2, [#allocation4]  }
  0xa5   :  { %122 = dma.done.wait [#allocation4], 256  }
  0xa6   :  { %123 = vsyncadd [#allocation4], 4294967040 }
  0xa7   :  { %67 = vsyncpa [#allocation3], 1 }
  0xa8   :  { %68 = vsyncpa [#allocation4], 1 }

</bundles_post_ra>
